<compile_context>
chip_gen: v7x
topology: tpu7x:2x2x1
jax: 0.10.0
libtpu: 0.0.40
codegen_flags: <defaults>
</compile_context>

<pallas_src>
import jax
import jax.numpy as jnp
from jax.experimental import pallas as pl
from jax.experimental.pallas import tpu as pltpu


def attacknet_kernel(x_ref, w1t_ref, b1_ref, w2_ref, b2_ref, o_ref):
    # x_ref: (D, TB) bf16/f32, batch on lanes.
    x = x_ref[...].astype(jnp.float32)
    # Hidden layer: (H, D) @ (D, TB) -> (H, TB) on the MXU, f32 accumulate.
    h = jnp.dot(w1t_ref[...], x, preferred_element_type=jnp.float32) + b1_ref[...]
    h = jnp.maximum(h, 0.0)
    # Output layer (8 -> 1): VPU multiply + sublane reduction (no MXU pass),
    # then scalar bias + sigmoid (EUP).
    z = jnp.sum(h * w2_ref[...], axis=0, keepdims=True) + b2_ref[...]   # (1, TB)
    o_ref[...] = jax.nn.sigmoid(z).astype(o_ref.dtype)


def attacknet_forward(x, w1, b1, w2, b2, *, batch_tile=512,
                      input_dtype=jnp.bfloat16):
    """x: (B, in_dim) f32. w1: (in_dim, 8), b1: (1, 8), w2: (8, 1), b2: (1, 1).

    Returns (B, 1) f32 probabilities, matching AttackNet.forward.
    """
    B, D = x.shape
    H = w1.shape[1]          # 8
    O = w2.shape[1]          # 1

    # Lane-dense layout plumbing (wrapper-side, no extra compute in-kernel).
    xT = x.T.astype(input_dtype)                     # (D, B), batch on lanes
    w1t = w1.T.astype(jnp.float32)                   # (H, D)
    b1c = b1.reshape(H, 1).astype(jnp.float32)       # (H, 1) -> broadcast over lanes
    w2c = w2.reshape(H, O).astype(jnp.float32)       # (H, 1)
    b2c = b2.reshape(O, 1).astype(jnp.float32)       # (1, 1)

    if B <= batch_tile:
        tb = B                                       # full-dim block (small batches)
    else:
        assert batch_tile % 128 == 0, "batch_tile must be a multiple of 128"
        tb = batch_tile
    grid = (pl.cdiv(B, tb),)

    out_t = pl.pallas_call(
        attacknet_kernel,
        out_shape=jax.ShapeDtypeStruct((O, B), jnp.float32),
        grid_spec=pltpu.PrefetchScalarGridSpec(
            num_scalar_prefetch=0,
            grid=grid,
            in_specs=[
                pl.BlockSpec((D, tb), lambda i: (0, i)),   # x^T tile (lane-dense)
                pl.BlockSpec((H, D), lambda i: (0, 0)),    # W1^T (full, ~1 KiB)
                pl.BlockSpec((H, 1), lambda i: (0, 0)),    # b1
                pl.BlockSpec((H, O), lambda i: (0, 0)),    # W2
                pl.BlockSpec((O, 1), lambda i: (0, 0)),    # b2
            ],
            out_specs=pl.BlockSpec((O, tb), lambda i: (0, i)),  # lane-dense output
        ),
        compiler_params=pltpu.CompilerParams(
            dimension_semantics=("parallel",),   # megacore sharding on v7x
        ),
    )(xT, w1t, b1c, w2c, b2c)

    return out_t.T                                   # (B, 1)


def init_params(key, in_dim, hidden=8, out=1):
    """Deterministic PyTorch-style Linear init: U(-1/sqrt(fan_in), 1/sqrt(fan_in))."""
    k1, k2, k3, k4 = jax.random.split(key, 4)
    bound1 = 1.0 / jnp.sqrt(in_dim)
    bound2 = 1.0 / jnp.sqrt(hidden)
    w1 = jax.random.uniform(k1, (in_dim, hidden), jnp.float32, -bound1, bound1)
    b1 = jax.random.uniform(k2, (1, hidden), jnp.float32, -bound1, bound1)
    w2 = jax.random.uniform(k3, (hidden, out), jnp.float32, -bound2, bound2)
    b2 = jax.random.uniform(k4, (1, out), jnp.float32, -bound2, bound2)
    return w1, b1, w2, b2


if __name__ == "__main__":
    key = jax.random.PRNGKey(0)
    kx, kp = jax.random.split(key)

    B, IN_DIM = 8, 32                       # small demo shapes, Linear(in_dim, 8)
    x = jax.random.normal(kx, (B, IN_DIM), jnp.float32)
    w1, b1, w2, b2 = init_params(kp, IN_DIM)

    out = attacknet_forward(x, w1, b1, w2, b2)
    out = jax.block_until_ready(out)

    # Pure-JAX reference of the same forward pass (x rounded to bf16 to match
    # the kernel's reduced-precision HBM transfer, then f32 math).
    x_r = x.astype(jnp.bfloat16).astype(jnp.float32)
    ref = jax.nn.sigmoid(jnp.maximum(x_r @ w1 + b1, 0.0) @ w2 + b2)
    assert out.shape == (B, 1)
    assert jnp.allclose(out, ref, atol=1e-4, rtol=1e-4), "mismatch vs reference"

    print("KERNEL_OK")
</pallas_src>

<mosaic_0001>
module attributes {stable_mosaic.version = 11 : i64} {
  func.func @attacknet_kernel(%arg0: i32, %arg1: memref<32x8xbf16, #tpu.memory_space<vmem>>, %arg2: memref<8x32xf32, #tpu.memory_space<vmem>>, %arg3: memref<8x1xf32, #tpu.memory_space<vmem>>, %arg4: memref<8x1xf32, #tpu.memory_space<vmem>>, %arg5: memref<1x1xf32, #tpu.memory_space<vmem>>, %arg6: memref<1x8xf32, #tpu.memory_space<vmem>>) attributes {dimension_semantics = [#tpu.dimension_semantics<parallel>], iteration_bounds = array<i64: 1>, scalar_prefetch = 0 : i64, scratch_operands = 0 : i64, tpu.core_type = #tpu.core_type<tc>, window_params = [{transform_indices = @transform_0, window_bounds = array<i64: 32, 8>}, {pipeline_mode = #tpu.pipeline_mode<synchronous>, transform_indices = @transform_1, window_bounds = array<i64: 8, 32>}, {pipeline_mode = #tpu.pipeline_mode<synchronous>, transform_indices = @transform_2, window_bounds = array<i64: 8, 1>}, {pipeline_mode = #tpu.pipeline_mode<synchronous>, transform_indices = @transform_3, window_bounds = array<i64: 8, 1>}, {pipeline_mode = #tpu.pipeline_mode<synchronous>, transform_indices = @transform_4, window_bounds = array<i64: 1, 1>}, {transform_indices = @transform_5, window_bounds = array<i64: 1, 8>}]} {
    %c0 = arith.constant 0 : index
    %c0_0 = arith.constant 0 : index
    %0 = vector.load %arg1[%c0, %c0_0] : memref<32x8xbf16, #tpu.memory_space<vmem>>, vector<32x8xbf16>
    %1 = arith.extf %0 : vector<32x8xbf16> to vector<32x8xf32>
    %c0_1 = arith.constant 0 : index
    %c0_2 = arith.constant 0 : index
    %2 = vector.load %arg2[%c0_1, %c0_2] : memref<8x32xf32, #tpu.memory_space<vmem>>, vector<8x32xf32>
    %cst = arith.constant dense<0.000000e+00> : vector<8x8xf32>
    %3 = tpu.matmul %2, %1, %cst {dimension_numbers = #tpu.dot_dimension_numbers<[1], [0], [0], [1], [0, 0, 1, 1], [], []>} : vector<8x32xf32>, vector<32x8xf32>, vector<8x8xf32> -> vector<8x8xf32>
    %c0_3 = arith.constant 0 : index
    %c0_4 = arith.constant 0 : index
    %4 = vector.load %arg3[%c0_3, %c0_4] : memref<8x1xf32, #tpu.memory_space<vmem>>, vector<8x1xf32>
    %5 = vector.broadcast %4 : vector<8x1xf32> to vector<8x8xf32>
    %6 = arith.addf %3, %5 : vector<8x8xf32>
    %cst_5 = arith.constant 0.000000e+00 : f32
    %7 = vector.broadcast %cst_5 : f32 to vector<8x8xf32>
    %8 = arith.maximumf %6, %7 : vector<8x8xf32>
    %c0_6 = arith.constant 0 : index
    %c0_7 = arith.constant 0 : index
    %9 = vector.load %arg4[%c0_6, %c0_7] : memref<8x1xf32, #tpu.memory_space<vmem>>, vector<8x1xf32>
    %10 = vector.broadcast %9 : vector<8x1xf32> to vector<8x8xf32>
    %11 = arith.mulf %8, %10 : vector<8x8xf32>
    %cst_8 = arith.constant dense<0.000000e+00> : vector<8xf32>
    %12 = vector.multi_reduction <add>, %11, %cst_8 [0] : vector<8x8xf32> to vector<8xf32>
    %13 = vector.shape_cast %12 : vector<8xf32> to vector<1x8xf32>
    %c0_9 = arith.constant 0 : index
    %c0_10 = arith.constant 0 : index
    %14 = vector.load %arg5[%c0_9, %c0_10] : memref<1x1xf32, #tpu.memory_space<vmem>>, vector<1x1xf32>
    %15 = vector.broadcast %14 : vector<1x1xf32> to vector<1x8xf32>
    %16 = arith.addf %13, %15 : vector<1x8xf32>
    %17 = arith.negf %16 : vector<1x8xf32>
    %18 = math.exp %17 : vector<1x8xf32>
    %cst_11 = arith.constant 1.000000e+00 : f32
    %19 = vector.broadcast %cst_11 : f32 to vector<1x8xf32>
    %20 = arith.addf %19, %18 : vector<1x8xf32>
    %21 = arith.divf %19, %20 : vector<1x8xf32>
    %c0_12 = arith.constant 0 : index
    %c0_13 = arith.constant 0 : index
    %22 = vector.load %arg6[%c0_12, %c0_13] : memref<1x8xf32, #tpu.memory_space<vmem>>, vector<1x8xf32>
    tpu.vector_store %arg6[%c0_12, %c0_13], %21 {strides = array<i32>} : memref<1x8xf32, #tpu.memory_space<vmem>>, vector<1x8xf32>,
    return
  }
  func.func @transform_0(%arg0: i32) -> (i32, i32) {
    %c0_i32 = arith.constant 0 : i32
    %c0_i32_0 = arith.constant 0 : i32
    return %c0_i32, %arg0 : i32, i32
  }
  func.func @transform_1(%arg0: i32) -> (i32, i32) {
    %c0_i32 = arith.constant 0 : i32
    %c0_i32_0 = arith.constant 0 : i32
    %c0_i32_1 = arith.constant 0 : i32
    return %c0_i32, %c0_i32_0 : i32, i32
  }
  func.func @transform_2(%arg0: i32) -> (i32, i32) {
    %c0_i32 = arith.constant 0 : i32
    %c0_i32_0 = arith.constant 0 : i32
    %c0_i32_1 = arith.constant 0 : i32
    return %c0_i32, %c0_i32_0 : i32, i32
  }
  func.func @transform_3(%arg0: i32) -> (i32, i32) {
    %c0_i32 = arith.constant 0 : i32
    %c0_i32_0 = arith.constant 0 : i32
    %c0_i32_1 = arith.constant 0 : i32
    return %c0_i32, %c0_i32_0 : i32, i32
  }
  func.func @transform_4(%arg0: i32) -> (i32, i32) {
    %c0_i32 = arith.constant 0 : i32
    %c0_i32_0 = arith.constant 0 : i32
    %c0_i32_1 = arith.constant 0 : i32
    return %c0_i32, %c0_i32_0 : i32, i32
  }
  func.func @transform_5(%arg0: i32) -> (i32, i32) {
    %c0_i32 = arith.constant 0 : i32
    %c0_i32_0 = arith.constant 0 : i32
    return %c0_i32, %arg0 : i32, i32
  }
}

</mosaic_0001>

<bundles_post_ra>
// kernel: tpu_custom_call.1
= control target key start
LH: loop header
LB: loop body
LE: loop exit
PB: predicated region body
PF: predicated region fallthrough
CT: control target
= control target key end

     0   :  { %s294_s0 = inlined_call_operand.vmem [shape: bf16[32,8], index: 0, kind: input, shape index: {}]   ;;  %s295_s1 = inlined_call_operand.vmem [shape: f32[8,32], index: 1, kind: input, shape index: {}]   ;;  %s296_s2 = inlined_call_operand.vmem [shape: f32[8,1], index: 2, kind: input, shape index: {}]   ;;  %s297_s3 = inlined_call_operand.vmem [shape: f32[8,1], index: 3, kind: input, shape index: {}]   ;;  %s298_s4 = inlined_call_operand.<no memory space> [shape: f32[1,1], index: 4, kind: input, shape index: {}]   ;;  %s299_s5 = inlined_call_operand.hbm [shape: f32[1,8], index: 5, kind: output, shape index: {}]  }
   0x1   :  { %v10_v0 = vstv %s298_s4 }
   0x2   :  { %11 = vst [vmem:[#allocation2] sm:$0x1] %v10_v0 }
   0x3   :  { %v164_v1 = vld [vmem:[%s294_s0] sm:$0xff]   ;;  %v229_v2 = vmov 0.0|0.0   ;;  %vm230_vm0 = vmmov 0   ;;  %v231_v3 = vmov 0.0   ;;  %v232_v5 = vmov 0  }
   0x4   :  { %188 = vmatprep.subr.bf16.mxu0 %v229_v2  ;;  %185 = vmatprep.mubr.msk.f32.mxu0 %vm230_vm0, %v231_v3  ;;  %v32_v4 = vld [vmem:[%s296_s2] sm:$0xff] }
   0x5   :  { %190 = vmatpush3.bf16.msra.mxu0 %v164_v1  ;;  %199 = vset.pattern.permute.xlu0 %v232_v5 }
   0x9   :  { %v128_v6 = vld [vmem:[#allocation2] sm:$0x1] }
   0xa   :  { %12 = vsyncpa [#allocation4], 0  ;;  %191 = vmatprep.subr.bf16.mxu0 %v229_v2  ;;  %v171_v7 = vld [vmem:[%s294_s0 + $0x8] sm:$0xff]   ;;  %35 = vperm.xlu0 %199, %v32_v4   ;;  %v113_v8 = vld [vmem:[%s297_s3] sm:$0xff]  ;;  %vm38_vm1 = vcmask 261120   ;;  %vm120_vm2 = vcmask 64512   ;;  %v134_v16 = vlaneseq }
   0xb   :  { %200 = vset.pattern.permute.xlu1 %v232_v5  ;;  %193 = vmatpush3.bf16.msra.mxu0 %v171_v7  ;;  %v31_v9 = vld [vmem:[%s295_s1] sm:$0xff]  ;;  %s233_s0 = smov [#allocation3]   ;;  %vm145_vm3 = vcmask 57344  }
   0xc   :  { %131 = vperm.xlu1 %200, %v128_v6   ;;  %v135_v20 = vshrl.u32 %v134_v16, 7  ;;  %s153_s1 = sshll.u32 %s233_s0, 4  ;;  %s154_s1 = int_to_ptr.vmem [resolvable:$true] %s153_s1 }
   0xd   :  { %s205_s3 = scalar_lea.vmem %s154_s1, 16  ;;  %s209_s28 = scalar_lea.vmem %s154_s1, 32 }
   0xe   :  { %116 = vperm.xlu0 %199, %v113_v8   ;;  %186 = vmatmul.mubr.msk.f32.vlgmr.msra.gmra.mrb[0].mxu0 %vm38_vm1, %v31_v9  ;;  %v136_v23 = vsub.s32 0, %v135_v20  ;;  %p206_p0 = scmp.ne.s32.totalorder %s154_s1, %s205_s3  ;;  %p210_p1 = scmp.lt.s32.totalorder %s154_s1, %s154_s1 }
   0xf   :  { %p211_p2 = scmp.lt.s32.totalorder %s209_s28, %s205_s3 }
  0x11   :  { %p212_p3 = por %p211_p2, %p210_p1 }
  0x13   :  { %p213_p4 = pnand %p212_p3, %p206_p0 }
  0x89   :  { %v36_v10 = vpop.permute.xlu0 %35 }
  0x8b   :  { %v132_v24 = vpop.permute.xlu1 %131 }
  0x8c   :  { %v137_v27 = vrot.slane %v132_v24, %v136_v23 }
  0x8d   :  { %v117_v15 = vpop.permute.xlu0 %116 }
  0xe1   :  { %v108_v11 = vpop.f32.mrb[0].mxu0 }
  0xe2   :  { %v109_v12 = vadd.f32 %v108_v11, %v36_v10  ;;  %v187_v13 = vpop.f32.mrb[1].mxu0 }
  0xe4   :  { %v112_v14 = vmax.f32 %v109_v12, 0.0 }
  0xe6   :  { %v119_v17 = vmul.f32 %v117_v15, %v112_v14 }
  0xe8   :  { %v121_v18 = vsel %vm120_vm2, %v119_v17, 0.0 }
  0xe9   :  { %v122_v19 = vrot.slane %v121_v18, 4 }
  0xeb   :  { %v123_v21 = vadd.f32 %v122_v19, %v121_v18 }
  0xed   :  { %v124_v22 = vrot.slane %v123_v21, 2 }
  0xef   :  { %v125_v25 = vadd.f32 %v124_v22, %v123_v21 }
  0xf1   :  { %v126_v26 = vrot.slane %v125_v25, 1 }
  0xf3   :  { %v127_v28 = vadd.f32 %v126_v26, %v125_v25 }
  0xf5   :  { %v138_v29 = vadd.f32 %v137_v27, %v127_v28 }
  0xf7   :  { %v162_v30 = vmul.f32 -1.442695, %v138_v29 }
  0xf9   :  { %201 = vpow2.f32 %v162_v30 }
 0x103   :  { %v202_v31 = vpop.eup %201 }
 0x104   :  { %v142_v32 = vadd.f32 1.0, %v202_v31 }
 0x106   :  { %203 = vrcp.f32 %v142_v32 }
 0x110   :  { %v204_v33 = vpop.eup %203 }
 0x111   :  { %146 = vst.msk [vmem:[#allocation3] sm:$0x1] %vm145_vm3, %v204_v33 }
 0x112   :  { %216 = shalt.err (!%p213_p4)
}
 0x113   :  { %s217_s6 = scalar_lea.hbm %s299_s5, 16 }
 0x114   :  { %p218_p5 = scmp.ne.s32.totalorder %s299_s5, %s217_s6  ;;  %p221_p6 = scmp.lt.u32.totalorder %s217_s6, %s299_s5 }
 0x116   :  { %p223_p7 = pnand %p221_p6, %p218_p5 }
 0x118   :  { %226 = shalt.err (!%p223_p7)
}
 0x119   :  { %156 = dma.vmem_to_hbm [thread:$0]  %s154_s1, 16, %s299_s5, [#allocation4]  }
 0x11a   :  { %227 = dma.done.wait [#allocation4], 16  }
 0x11b   :  { %228 = vsyncadd [#allocation4], 4294967280 }
 0x11c   :  { %160 = vsyncpa [#allocation4], 1 }

</bundles_post_ra>
